<compile_context>
chip_gen: v7x
topology: tpu7x:2x2x1
jax: 0.10.0
libtpu: 0.0.40
codegen_flags: <defaults>
</compile_context>

<pallas_src>
import jax
import jax.numpy as jnp
from jax import lax
from jax.experimental import pallas as pl
from jax.experimental.pallas import tpu as pltpu


def _pick_chunk_channels(c, h, w, budget_bytes=512 * 1024):
    """Largest divisor of C whose (cc, H, W) f32 slab stays under ~budget."""
    target = max(1, budget_bytes // (h * w * 4))
    best = 1
    for d in range(1, c + 1):
        if c % d == 0 and d <= target:
            best = d
    return best


def _window_sum_unaligned(x, axis, pad, fill):
    """(2*pad+1)-tap window sum along `axis`; out-of-range taps contribute the
    constant `fill`.  Slice+concat fallback for non-(8,128)-aligned shapes."""
    n = x.shape[axis]
    total = x
    for s in range(1, pad + 1):
        fshape = list(x.shape)
        fshape[axis] = s
        fblk = jnp.full(tuple(fshape), fill, x.dtype)
        lo = lax.slice_in_dim(x, 0, n - s, axis=axis)   # x shifted by +s
        hi = lax.slice_in_dim(x, s, n, axis=axis)       # x shifted by -s
        total = total + jnp.concatenate([fblk, lo], axis=axis)
        total = total + jnp.concatenate([hi, fblk], axis=axis)
    return total


def _make_soft_detection_kernel(c, h, w, pad, ksize, chunk_c):
    """Per-sample kernel: one (1, C, H, W) block in, one (1, H, W) block out."""
    aligned = (h % 8 == 0) and (w % 128 == 0)   # roll/reshape fast path
    n_chunks = c // chunk_c
    rows = chunk_c * h
    kf = float(ksize)

    def kernel(x_ref, out_ref):
        # ---------- pass 1: depth-wise max & per-sample max (ReLU'd) --------
        # max_c relu(x) == relu(max_c x): avoids a full-slab ReLU temporary.
        dmax = jnp.maximum(jnp.max(x_ref[0], axis=0).astype(jnp.float32), 0.0)
        inv_max = 1.0 / jnp.max(dmax)                      # 1 / max_per_sample

        if aligned:
            # Edge masks for the roll-based window sum, built once and hoisted
            # out of the tap/chunk loops (broadcast_in_dim is not CSE'd).
            # The chunk is viewed as a dense (chunk_c*H, W) slab, so the H
            # masks repeat every `h` rows (this also masks channel seams).
            row_in_h = lax.broadcasted_iota(
                jnp.int32, (chunk_c, h, w), 1).reshape(rows, w)
            col_idx = lax.broadcasted_iota(jnp.int32, (rows, w), 1)
            row_lo = [row_in_h < s for s in range(1, pad + 1)]
            row_hi = [row_in_h >= h - s for s in range(1, pad + 1)]
            col_lo = [col_idx < s for s in range(1, pad + 1)]
            col_hi = [col_idx >= w - s for s in range(1, pad + 1)]

        def window_sum_rows(e):
            if not aligned:
                return _window_sum_unaligned(e, axis=1, pad=pad, fill=1.0)
            r = e
            for s in range(1, pad + 1):
                # pltpu.roll follows jnp.roll: out[i] = x[(i - shift) % n].
                down = pltpu.roll(e, shift=s, axis=0)          # e[i - s]
                up = pltpu.roll(e, shift=rows - s, axis=0)     # e[i + s]
                r = r + jnp.where(row_lo[s - 1], 1.0, down)
                r = r + jnp.where(row_hi[s - 1], 1.0, up)
            return r

        def window_sum_cols(r):
            if not aligned:
                return _window_sum_unaligned(r, axis=2, pad=pad, fill=kf)
            ss = r
            for s in range(1, pad + 1):
                right = pltpu.roll(r, shift=s, axis=1)         # r[i - s]
                left = pltpu.roll(r, shift=w - s, axis=1)      # r[i + s]
                # A fully-padded column H-sums to exactly ksize -> fill = k.
                ss = ss + jnp.where(col_lo[s - 1], kf, right)
                ss = ss + jnp.where(col_hi[s - 1], kf, left)
            return ss

        def chunk_score(xc):
            # xc: (chunk_c, H, W) raw slice of one sample.
            xr = jnp.maximum(xc.astype(jnp.float32), 0.0)      # ReLU
            x2 = xr.reshape(rows, w) if aligned else xr        # lane-dense view
            e = jnp.exp(x2 * inv_max)                          # EUP
            ss = window_sum_cols(window_sum_rows(e))           # k x k sum, pad=1.0
            # local_max_score * x; the channel-independent 1/depth_wise_max is
            # hoisted out of the channel max (perf review).
            t = e * x2 * pl.reciprocal(ss, approx=False)
            if aligned:
                t = t.reshape(chunk_c, h, w)
            return jnp.max(t, axis=0)                          # (H, W)

        # ---------- pass 2: chunked over C, running (H, W) max --------------
        if n_chunks == 1:
            running = chunk_score(x_ref[0])
        else:
            def body(i, run):
                start = pl.multiple_of(i * chunk_c, chunk_c)
                xc = x_ref[0, pl.ds(start, chunk_c), :, :]
                return jnp.maximum(run, chunk_score(xc))
            running = lax.fori_loop(0, n_chunks, body,
                                    jnp.zeros((h, w), jnp.float32))

        score = running / dmax                   # hoisted depth-wise norm
        out_ref[0] = score * (1.0 / jnp.sum(score))

    return kernel


def soft_detection(x, soft_local_max_size=3):
    """Pallas implementation of SoftDetectionModule.forward.  x: (B, C, H, W)."""
    b, c, h, w = x.shape
    pad = soft_local_max_size // 2
    chunk_c = _pick_chunk_channels(c, h, w)
    kernel = _make_soft_detection_kernel(c, h, w, pad, soft_local_max_size,
                                         chunk_c)

    # VMEM budget: double-buffered input block + a few chunk-sized temps.
    # Clamped to 64 MiB so it also fits v7x's 64 MiB physical VMEM; the 32 MiB
    # floor is ample headroom on every generation for the chunked compute.
    in_block_bytes = c * h * w * x.dtype.itemsize
    vmem_limit = int(min(64 * 1024 * 1024,
                         max(32 * 1024 * 1024, 4 * in_block_bytes)))

    grid_spec = pltpu.PrefetchScalarGridSpec(
        num_scalar_prefetch=0,
        grid=(b,),
        in_specs=[pl.BlockSpec((1, c, h, w), lambda i: (i, 0, 0, 0))],
        out_specs=pl.BlockSpec((1, h, w), lambda i: (i, 0, 0)),
    )

    return pl.pallas_call(
        kernel,
        grid_spec=grid_spec,
        out_shape=jax.ShapeDtypeStruct((b, h, w), jnp.float32),
        compiler_params=pltpu.CompilerParams(
            dimension_semantics=("parallel",),   # batch samples independent
            vmem_limit_bytes=vmem_limit,
        ),
    )(x)


def soft_detection_ref(x, soft_local_max_size=3):
    """Pure-JAX reference mirroring the PyTorch forward exactly."""
    b = x.shape[0]
    pad = soft_local_max_size // 2
    k = soft_local_max_size
    x = jax.nn.relu(x)
    max_per_sample = jnp.max(x.reshape(b, -1), axis=1).reshape(b, 1, 1, 1)
    exp = jnp.exp(x / max_per_sample)
    padded = jnp.pad(exp, ((0, 0), (0, 0), (pad, pad), (pad, pad)),
                     mode="constant", constant_values=1.0)
    sum_exp = lax.reduce_window(padded, 0.0, lax.add,
                                (1, 1, k, k), (1, 1, 1, 1), "VALID")
    local_max_score = exp / sum_exp
    depth_wise_max = jnp.max(x, axis=1)
    depth_wise_max_score = x / depth_wise_max[:, None]
    all_scores = local_max_score * depth_wise_max_score
    score = jnp.max(all_scores, axis=1)
    score = score / jnp.sum(score.reshape(b, -1), axis=1).reshape(b, 1, 1)
    return score


if __name__ == "__main__":
    key = jax.random.PRNGKey(0)
    # Small demo shape; W = 128 keeps the last dim lane-dense so the roll-based
    # fast path (the main perf-review change) is exercised.
    B, C, H, W = 2, 4, 16, 128
    # Strictly positive features (the D2-Net maps feeding this module are
    # post-ReLU); avoids the 0/0 the reference would also hit.
    x = jax.random.uniform(key, (B, C, H, W), dtype=jnp.float32,
                           minval=0.1, maxval=1.0)

    out = jax.block_until_ready(soft_detection(x))
    ref = soft_detection_ref(x)

    assert out.shape == (B, H, W)
    err = float(jnp.max(jnp.abs(out - ref)))
    assert bool(jnp.allclose(out, ref, atol=1e-6, rtol=1e-4)), (
        "max abs err = %e" % err)
    print("KERNEL_OK")
</pallas_src>

<mosaic_0001>
module attributes {stable_mosaic.version = 11 : i64} {
  func.func @kernel(%arg0: i32, %arg1: memref<1x4x16x128xf32, #tpu.memory_space<vmem>>, %arg2: memref<1x16x128xf32, #tpu.memory_space<vmem>>) attributes {dimension_semantics = [#tpu.dimension_semantics<parallel>], iteration_bounds = array<i64: 2>, scalar_prefetch = 0 : i64, scratch_operands = 0 : i64, tpu.core_type = #tpu.core_type<tc>, window_params = [{transform_indices = @transform_0, window_bounds = array<i64: 1, 4, 16, 128>}, {transform_indices = @transform_1, window_bounds = array<i64: 1, 16, 128>}]} {
    %c0 = arith.constant 0 : index
    %c0_0 = arith.constant 0 : index
    %c0_1 = arith.constant 0 : index
    %c0_2 = arith.constant 0 : index
    %0 = vector.load %arg1[%c0, %c0_0, %c0_1, %c0_2] : memref<1x4x16x128xf32, #tpu.memory_space<vmem>>, vector<1x4x16x128xf32>
    %1 = vector.shape_cast %0 : vector<1x4x16x128xf32> to vector<4x16x128xf32>
    %cst = arith.constant dense<0xFF800000> : vector<16x128xf32>
    %2 = vector.multi_reduction <maximumf>, %1, %cst [0] : vector<4x16x128xf32> to vector<16x128xf32>
    %cst_3 = arith.constant 0.000000e+00 : f32
    %3 = vector.broadcast %cst_3 : f32 to vector<16x128xf32>
    %4 = arith.maximumf %2, %3 : vector<16x128xf32>
    %5 = vector.shape_cast %4 : vector<16x128xf32> to vector<1x16x128xf32>
    %cst_4 = arith.constant dense<0xFF800000> : vector<1xf32>
    %6 = vector.multi_reduction <maximumf>, %5, %cst_4 [1, 2] : vector<1x16x128xf32> to vector<1xf32>
    %7 = vector.shape_cast %6 : vector<1xf32> to vector<1x1x1xf32>
    %8 = vector.extract %7[0, 0, 0] : f32 from vector<1x1x1xf32>
    %cst_5 = arith.constant 1.000000e+00 : f32
    %9 = arith.divf %cst_5, %8 : f32
    %10 = tpu.iota {dimensions = array<i32: 1>} : vector<4x16x128xi32>
    %11 = vector.shape_cast %10 : vector<4x16x128xi32> to vector<64x128xi32>
    %12 = tpu.iota {dimensions = array<i32: 1>} : vector<64x128xi32>
    %c1_i32 = arith.constant 1 : i32
    %13 = vector.broadcast %c1_i32 : i32 to vector<64x128xi32>
    %14 = arith.cmpi slt, %11, %13 : vector<64x128xi32>
    %c15_i32 = arith.constant 15 : i32
    %15 = vector.broadcast %c15_i32 : i32 to vector<64x128xi32>
    %16 = arith.cmpi sge, %11, %15 : vector<64x128xi32>
    %c1_i32_6 = arith.constant 1 : i32
    %17 = vector.broadcast %c1_i32_6 : i32 to vector<64x128xi32>
    %18 = arith.cmpi slt, %12, %17 : vector<64x128xi32>
    %c127_i32 = arith.constant 127 : i32
    %19 = vector.broadcast %c127_i32 : i32 to vector<64x128xi32>
    %20 = arith.cmpi sge, %12, %19 : vector<64x128xi32>
    %c0_7 = arith.constant 0 : index
    %c0_8 = arith.constant 0 : index
    %c0_9 = arith.constant 0 : index
    %c0_10 = arith.constant 0 : index
    %21 = vector.load %arg1[%c0_7, %c0_8, %c0_9, %c0_10] : memref<1x4x16x128xf32, #tpu.memory_space<vmem>>, vector<1x4x16x128xf32>
    %22 = vector.shape_cast %21 : vector<1x4x16x128xf32> to vector<4x16x128xf32>
    %cst_11 = arith.constant 0.000000e+00 : f32
    %23 = vector.broadcast %cst_11 : f32 to vector<4x16x128xf32>
    %24 = arith.maximumf %22, %23 : vector<4x16x128xf32>
    %25 = vector.shape_cast %24 : vector<4x16x128xf32> to vector<64x128xf32>
    %26 = vector.broadcast %9 : f32 to vector<64x128xf32>
    %27 = arith.mulf %25, %26 : vector<64x128xf32>
    %28 = math.exp %27 : vector<64x128xf32>
    %c1_i32_12 = arith.constant 1 : i32
    %29 = tpu.dynamic_rotate %28 by %c1_i32_12 dim 0 : vector<64x128xf32>, i32 -> vector<64x128xf32>
    %c63_i32 = arith.constant 63 : i32
    %30 = tpu.dynamic_rotate %28 by %c63_i32 dim 0 : vector<64x128xf32>, i32 -> vector<64x128xf32>
    %cst_13 = arith.constant 1.000000e+00 : f32
    %31 = vector.broadcast %cst_13 : f32 to vector<64x128xf32>
    %32 = arith.select %14, %31, %29 : vector<64x128xi1>, vector<64x128xf32>
    %33 = arith.addf %28, %32 : vector<64x128xf32>
    %cst_14 = arith.constant 1.000000e+00 : f32
    %34 = vector.broadcast %cst_14 : f32 to vector<64x128xf32>
    %35 = arith.select %16, %34, %30 : vector<64x128xi1>, vector<64x128xf32>
    %36 = arith.addf %33, %35 : vector<64x128xf32>
    %c1_i32_15 = arith.constant 1 : i32
    %37 = tpu.dynamic_rotate %36 by %c1_i32_15 dim 1 : vector<64x128xf32>, i32 -> vector<64x128xf32>
    %c127_i32_16 = arith.constant 127 : i32
    %38 = tpu.dynamic_rotate %36 by %c127_i32_16 dim 1 : vector<64x128xf32>, i32 -> vector<64x128xf32>
    %cst_17 = arith.constant 3.000000e+00 : f32
    %39 = vector.broadcast %cst_17 : f32 to vector<64x128xf32>
    %40 = arith.select %18, %39, %37 : vector<64x128xi1>, vector<64x128xf32>
    %41 = arith.addf %36, %40 : vector<64x128xf32>
    %cst_18 = arith.constant 3.000000e+00 : f32
    %42 = vector.broadcast %cst_18 : f32 to vector<64x128xf32>
    %43 = arith.select %20, %42, %38 : vector<64x128xi1>, vector<64x128xf32>
    %44 = arith.addf %41, %43 : vector<64x128xf32>
    %45 = arith.mulf %28, %25 : vector<64x128xf32>
    %46 = tpu.reciprocal %44 : vector<64x128xf32> -> vector<64x128xf32>
    %47 = arith.mulf %45, %46 : vector<64x128xf32>
    %48 = vector.shape_cast %47 : vector<64x128xf32> to vector<4x16x128xf32>
    %cst_19 = arith.constant dense<0xFF800000> : vector<16x128xf32>
    %49 = vector.multi_reduction <maximumf>, %48, %cst_19 [0] : vector<4x16x128xf32> to vector<16x128xf32>
    %50 = arith.divf %49, %4 : vector<16x128xf32>
    %51 = vector.shape_cast %50 : vector<16x128xf32> to vector<1x16x128xf32>
    %cst_20 = arith.constant dense<0.000000e+00> : vector<1xf32>
    %52 = vector.multi_reduction <add>, %51, %cst_20 [1, 2] : vector<1x16x128xf32> to vector<1xf32>
    %53 = vector.shape_cast %52 : vector<1xf32> to vector<1x1x1xf32>
    %54 = vector.extract %53[0, 0, 0] : f32 from vector<1x1x1xf32>
    %cst_21 = arith.constant 1.000000e+00 : f32
    %55 = arith.divf %cst_21, %54 : f32
    %56 = vector.broadcast %55 : f32 to vector<16x128xf32>
    %57 = arith.mulf %50, %56 : vector<16x128xf32>
    %c0_22 = arith.constant 0 : index
    %c0_23 = arith.constant 0 : index
    %c0_24 = arith.constant 0 : index
    %58 = vector.load %arg2[%c0_22, %c0_23, %c0_24] : memref<1x16x128xf32, #tpu.memory_space<vmem>>, vector<1x16x128xf32>
    %59 = vector.shape_cast %58 : vector<1x16x128xf32> to vector<16x128xf32>
    %60 = vector.shape_cast %57 : vector<16x128xf32> to vector<1x16x128xf32>
    tpu.vector_store %arg2[%c0_22, %c0_23, %c0_24], %60 {strides = array<i32>} : memref<1x16x128xf32, #tpu.memory_space<vmem>>, vector<1x16x128xf32>,
    return
  }
  func.func @transform_0(%arg0: i32) -> (i32, i32, i32, i32) {
    %c0_i32 = arith.constant 0 : i32
    %c0_i32_0 = arith.constant 0 : i32
    %c0_i32_1 = arith.constant 0 : i32
    %c0_i32_2 = arith.constant 0 : i32
    return %arg0, %c0_i32, %c0_i32_0, %c0_i32_1 : i32, i32, i32, i32
  }
  func.func @transform_1(%arg0: i32) -> (i32, i32, i32) {
    %c0_i32 = arith.constant 0 : i32
    %c0_i32_0 = arith.constant 0 : i32
    %c0_i32_1 = arith.constant 0 : i32
    return %arg0, %c0_i32, %c0_i32_0 : i32, i32, i32
  }
}

</mosaic_0001>

<bundles_post_ra>
// kernel: tpu_custom_call.1
= control target key start
LH: loop header
LB: loop body
LE: loop exit
PB: predicated region body
PF: predicated region fallthrough
CT: control target
= control target key end

     0   :  { %6 = vsyncpa [#allocation3], 0  ;;  %s1098_s0 = inlined_call_operand.hbm [shape: f32[2,4,16,128], index: 0, kind: input, shape index: {}]   ;;  %s1099_s1 = inlined_call_operand.hbm [shape: f32[2,16,128], index: 1, kind: output, shape index: {}]  }
   0x1   :  { %8 = vsyncpa [#allocation3 + $0x1], 0 }
   0x2   :  { %9 = vsyncpa [#allocation4], 0 }
   0x3   :  { %11 = vsyncpa [#allocation4 + $0x1], 0  ;;  %s708_s6 = smov 0   ;;  %s710_s7 = smov 0  }
   0x4   :  { %s712_s8 = smov 0   ;;  %s714_s9 = smov 0  }
   0x5 LB: > { %s729_s10 = sadd.s32 4294967295, %s688_s9   ;;  %s476_s11 = sadd.s32 4294967294, %s688_s9   ;;  %s688_s9 = sphi %s714_s9, %s1112_s9   ;;  %s684_s8 = sphi %s712_s8, %s1111_s8   ;;  %s680_s7 = sphi %s710_s7, %s1110_s7   ;;  %s676_s6 = sphi %s708_s6, %s1109_s6  }
   0x6   : > { %s733_s12 = sadd.s32 1, %s688_s9   ;;  %s24_s13 = sadd.s32 1, %s684_s8 }
   0x7   : > { %s21_s14 = ssub.s32 %s688_s9, %s733_s12  ;;  %p31_p0 = scmp.ne.s32.totalorder %s684_s8, %s680_s7 }
   0x8   : > { %p22_p1 = scmp.eq.s32.totalorder %s21_s14, 0  ;;  %p32_p2 = scmp.eq.s32.totalorder %s688_s9, 0 }
   0x9   : > { %p37_p3 = scmp.ne.s32.totalorder %s680_s7, %s676_s6  ;;  %p38_p4 = scmp.eq.s32.totalorder %s729_s10, 0 }
   0xa   : > { %s745_s15 = scalar_select %p22_p1, %s684_s8, %s24_s13  }
   0xb   : > { %p747_p5 = por %p32_p2, %p31_p0  ;;  %p751_p6 = por %p38_p4, %p37_p3 }
   0xc   : > { %p61_p7 = scmp.eq.s32.totalorder %s729_s10, 1  ;;  %p67_p8 = scmp.eq.s32.totalorder %s476_s11, 1 }
   0xd   : > { %p512_p10 = scmp.lt.s32.totalorder %s688_s9, 2  ;;  %s87_s20 = sand.u32 1, %s684_s8  }
   0xe   : > { %p758_p11 = por %p61_p7, %p31_p0  ;;  %p762_p12 = por %p67_p8, %p37_p3 }
   0xf   : > { %s490_s21 = sshll.u32 %s688_s9, 10  ;;  %s479_s22 = sshll.u32 %s87_s20, 6 }
  0x10   : > { %s1103_s18 = scalar_select %p758_p11, 1, 0 }
  0x11   : > { %s1104_s19 = scalar_select %p762_p12, 1, 0 }
  0x12   : > { %s771_s25 = scalar_lea.hbm %s1098_s0, %s490_s21  ;;  %s91_s26 = scalar_lea.vmem [#allocation2], %s479_s22 }
  0x13   : > { %s98_s27 = sshll.u32 %s91_s26, 4  ;;  %p775_p13 = pnand %p512_p10, %p747_p5  ;;  %s779_s27 = int_to_ptr.vmem [resolvable:$true] %s98_s27 }
  0x14   : > { %s781_s29 = scalar_lea.sflag [#allocation3], %s87_s20  ;;  %s592_s30 = scalar_lea.hbm %s771_s25, 1024 }
  0x15   : > { %p593_p0 = scmp.ne.s32.totalorder %s771_s25, %s592_s30  ;;  %p594_p1 = pneg %p775_p13 }
  0x16   : > { %s597_s4 = scalar_lea.hbm %s1098_s0, 2048  ;;  %p598_p4 = scmp.lt.u32.totalorder %s771_s25, %s1098_s0 }
  0x17   : > { %p595_p2 = pnand %p594_p1, %p593_p0  ;;  %p599_p5 = scmp.lt.u32.totalorder %s597_s4, %s592_s30 }
  0x18   : > { %p601_p8 = scmp.lt.u32.totalorder %s592_s30, %s771_s25 }
  0x19   : > { %p596_p3 = pneg %p595_p2  ;;  %p600_p7 = por %p599_p5, %p598_p4 }
  0x1b   : > { %p602_p10 = por %p601_p8, %p600_p7 }
  0x1d   : > { %p603_p9 = pnand %p602_p10, %p596_p3 }
  0x1f   : > { %606 = shalt.err (!%p603_p9)
}
  0x20   : > { %s607_s13 = scalar_lea.vmem %s779_s27, 1024  ;;  %s690_s14 = smov [#allocation2]  }
  0x21   : > { %p608_p0 = scmp.ne.s32.totalorder %s779_s27, %s607_s13  ;;  %s612_s16 = sshll.u32 %s690_s14, 4  ;;  %s613_s16 = int_to_ptr.vmem [resolvable:$false] %s612_s16 }
  0x22   : > { %s614_s20 = scalar_lea.vmem %s613_s16, 2048  ;;  %p615_p11 = scmp.lt.s32.totalorder %s779_s27, %s613_s16 }
  0x23   : > { %p610_p2 = pnand %p608_p0, %p594_p1  ;;  %p616_p4 = scmp.lt.s32.totalorder %s614_s20, %s607_s13 }
  0x25   : > { %p611_p12 = pneg %p610_p2  ;;  %p617_p5 = por %p616_p4, %p615_p11 }
  0x27   : > { %p618_p7 = pnand %p617_p5, %p611_p12 }
  0x29   : > { %621 = shalt.err (!%p618_p7)
}
  0x2a   : > { %s691_s21 = smov 128   ;;  %s692_s22 = smov 8  }
  0x2b   : > { %507 = dma.hbm_to_vmem [thread:$0]  (!%p775_p13), %s771_s25, 1024, %s779_s27, %s781_s29, %s691_s21, %s691_s21, %s692_s22  }
  0x2c   : > { %p482_p9 = scmp.ge.s32.totalorder %s688_s9, 1  ;;  %p106_p1 = scmp.lt.s32.totalorder %s688_s9, 3 }
  0x2e   : > { %p107_p3 = pnand %p482_p9, %p106_p1 }
  0x2f   : > { %s812_s23 = sand.u32 (!%p107_p3), 1, %s680_s7  }
  0x30   : > { %110 = sbr.rel (%p107_p3) target bundleno = 820 (0x334), region = 24  ;;  %s483_s24 = sshll.u32 (!%p107_p3), %s812_s23, 6 }
  0x31   : > { %s113_s26 = scalar_lea.sflag (!%p107_p3), [#allocation3], %s812_s23  ;;  %s116_s30 = scalar_lea.vmem (!%p107_p3), [#allocation2], %s483_s24 }
  0x37   : > { %667 = dma.done.wait (%p751_p6), %s113_s26, 1024  }
  0x38   : > { %669 = vsyncadd (%p751_p6), %s113_s26, 4294966272  ;;  %v820_v0 = vld [vmem:[%s116_s30] sm:$0xff]  ;;  %v822_v1 = vld [vmem:[%s116_s30 + $0x8] sm:$0xff]  ;;  %v164_v49 = vlaneseq  ;;  %s693_s27 = smov 1   ;;  %s694_s28 = smov 127  }
  0x39   : > { %v824_v2 = vld [vmem:[%s116_s30 + $0x10] sm:$0xff]  ;;  %v826_v3 = vld [vmem:[%s116_s30 + $0x18] sm:$0xff]  ;;  %v828_v4 = vld [vmem:[%s116_s30 + $0x20] sm:$0xff]  ;;  %v175_v26 = vmax.f32 %v820_v0, 0.0  ;;  %v176_v27 = vmax.f32 %v822_v1, 0.0  ;;  %s484_s2 = sshll.u32 %s812_s23, 4 }
  0x3a   : > { %v830_v5 = vld [vmem:[%s116_s30 + $0x28] sm:$0xff]  ;;  %v832_v6 = vld [vmem:[%s116_s30 + $0x30] sm:$0xff]  ;;  %v834_v7 = vld [vmem:[%s116_s30 + $0x38] sm:$0xff]  ;;  %v143_v8 = vmax.f32 %v820_v0, %v828_v4  ;;  %v177_v28 = vmax.f32 %v824_v2, 0.0  ;;  %v178_v29 = vmax.f32 %v826_v3, 0.0  ;;  %v179_v30 = vmax.f32 %v828_v4, 0.0 }
  0x3b   : > { %v146_v9 = vmax.f32 %v822_v1, %v830_v5  ;;  %v144_v10 = vmax.f32 %v824_v2, %v832_v6  ;;  %v147_v11 = vmax.f32 %v826_v3, %v834_v7  ;;  %v180_v31 = vmax.f32 %v830_v5, 0.0  ;;  %s134_s3 = scalar_lea.vmem [#allocation5], %s484_s2  ;;  %s491_s5 = sshll.u32 %s729_s10, 8 }
  0x3c   : > { %v181_v32 = vmax.f32 %v832_v6, 0.0  ;;  %v182_v33 = vmax.f32 %v834_v7, 0.0  ;;  %v873_v52 = vshrl.u32 %v164_v49, 7  ;;  %v992_v5 = vand.u32 127, %v164_v49  ;;  %s403_s4 = sshll.u32 %s134_s3, 4  ;;  %s1054_s16 = scalar_lea.hbm %s1099_s1, %s491_s5  ;;  %s1049_s4 = int_to_ptr.vmem [resolvable:$true] %s403_s4 }
  0x3d   : > { %v844_v12 = vmax.f32 %v143_v8, %v144_v10  ;;  %v846_v13 = vmax.f32 %v146_v9, %v147_v11  ;;  %s390_s20 = scalar_lea.sflag [#allocation4], %s812_s23  ;;  %s622_s21 = scalar_lea.vmem %s1049_s4, 256 }
  0x3e   : > { %v876_v53 = vadd.s32 8, %v873_v52  ;;  %vm169_vm0 = vcmp.lt.s32.totalorder %v873_v52, 1  ;;  %vm232_vm1 = vcmp.lt.s32.totalorder %v873_v52, 7  ;;  %vm173_vm3 = vcmp.lt.s32.totalorder %v992_v5, 1  ;;  %p623_p6 = scmp.ne.s32.totalorder %s1049_s4, %s622_s21  ;;  %p1106_p11 = scmp.ne.s32.totalorder %s1103_s18, 0 }
  0x3f   : > { %v149_v14 = vmax.f32 %v844_v12, 0.0  ;;  %v150_v15 = vmax.f32 %v846_v13, 0.0  ;;  %vm174_vm4 = vcmp.ge.s32.totalorder %v992_v5, 127  ;;  %s695_s10 = smov [#allocation5]  }
  0x40   : > { %vm172_vm2 = vcmp.ge.s32.totalorder %v876_v53, 15  ;;  %p624_p12 = pnand %p623_p6, %p1106_p11  ;;  %s626_s22 = sshll.u32 %s695_s10, 4  ;;  %s627_s22 = int_to_ptr.vmem [resolvable:$false] %s626_s22 }
  0x41   : > { %v151_v16 = vmax.f32 %v149_v14, %v150_v15  ;;  %s628_s24 = scalar_lea.vmem %s627_s22, 512  ;;  %p629_p8 = scmp.lt.s32.totalorder %s1049_s4, %s627_s22 }
  0x42   : > { %p625_p13 = pneg %p624_p12  ;;  %p630_p10 = scmp.lt.s32.totalorder %s628_s24, %s622_s21 }
  0x43   : > { %152 = vmax.xlane.f32.xlu0 %v151_v16 }
  0x44   : > { %p631_p0 = por %p630_p10, %p629_p8 }
  0x46   : > { %p632_p2 = pnand %p631_p0, %p625_p13 }
  0xd0   : > { %v153_v17 = vpop.xlane.xlu0 %152 }
  0xd1   : > { %v154_v18 = vrot.slane %v153_v17, 4 }
  0xd3   : > { %v155_v19 = vmax.f32 %v153_v17, %v154_v18 }
  0xd5   : > { %v156_v20 = vrot.slane %v155_v19, 2 }
  0xd7   : > { %v157_v21 = vmax.f32 %v155_v19, %v156_v20 }
  0xd9   : > { %v158_v22 = vrot.slane %v157_v21, 1 }
  0xdb   : > { %v159_v23 = vmax.f32 %v157_v21, %v158_v22 }
  0xdd   : > { %492 = vpush %v159_v23 }
 0x10e   : > { %s493_s17 = spop %492 }
 0x10f   : > { %v161_v24 = vstv %s493_s17 }
 0x110   : > { %552 = vrcp.f32 %v161_v24 }
 0x11a   : > { %v553_v25 = vpop.eup %552 }
 0x11b   : > { %494 = vpush %v553_v25 }
 0x14c   : > { %s495_s25 = spop %494 }
 0x14d   : > { %v183_v34 = vstv %s495_s25 }
 0x14e   : > { %v184_v35 = vmul.f32 %v183_v34, %v175_v26  ;;  %v185_v36 = vmul.f32 %v183_v34, %v176_v27  ;;  %v186_v37 = vmul.f32 %v183_v34, %v177_v28  ;;  %v187_v38 = vmul.f32 %v183_v34, %v178_v29 }
 0x14f   : > { %v188_v39 = vmul.f32 %v183_v34, %v179_v30  ;;  %v189_v40 = vmul.f32 %v183_v34, %v180_v31  ;;  %v190_v41 = vmul.f32 %v183_v34, %v181_v32  ;;  %v191_v45 = vmul.f32 %v183_v34, %v182_v33 }
 0x150   : > { %v192_v42 = vmul.f32 1.442695, %v184_v35  ;;  %v194_v43 = vmul.f32 1.442695, %v185_v36  ;;  %v196_v44 = vmul.f32 1.442695, %v186_v37 }
 0x151   : > { %v198_v46 = vmul.f32 1.442695, %v187_v38  ;;  %v200_v47 = vmul.f32 1.442695, %v188_v39  ;;  %v202_v48 = vmul.f32 1.442695, %v189_v40 }
 0x152   : > { %554 = vpow2.f32 %v192_v42  ;;  %v204_v50 = vmul.f32 1.442695, %v190_v41  ;;  %v206_v51 = vmul.f32 1.442695, %v191_v45 }
 0x153   : > { %556 = vpow2.f32 %v194_v43 }
 0x154   : > { %558 = vpow2.f32 %v196_v44 }
 0x155   : > { %560 = vpow2.f32 %v198_v46 }
 0x156   : > { %562 = vpow2.f32 %v200_v47 }
 0x157   : > { %564 = vpow2.f32 %v202_v48 }
 0x158   : > { %566 = vpow2.f32 %v204_v50 }
 0x159   : > { %568 = vpow2.f32 %v206_v51 }
 0x15c   : > { %v555_v54 = vpop.eup %554 }
 0x15d   : > { %v557_v55 = vpop.eup %556  ;;  %v208_v56 = vrot.slane %v555_v54, 7  ;;  %v224_v57 = vrot.slane %v555_v54, 1  ;;  %v880_v58 = vmul.f32 %v555_v54, %v175_v26 }
 0x15e   : > { %v559_v59 = vpop.eup %558  ;;  %v209_v60 = vrot.slane %v557_v55, 7  ;;  %v225_v61 = vrot.slane %v557_v55, 1  ;;  %v882_v62 = vmul.f32 %v557_v55, %v176_v27 }
 0x15f   : > { %v561_v63 = vpop.eup %560  ;;  %v226_v0 = vrot.slane %v559_v59, 1  ;;  %v210_v1 = vrot.slane %v559_v59, 7  ;;  %v885_v2 = vmul.f32 %v559_v59, %v177_v28 }
 0x160   : > { %v563_v8 = vpop.eup %562  ;;  %v222_v9 = vsel %vm169_vm0, %v208_v56, %v209_v60  ;;  %v239_v10 = vsel %vm232_vm1, %v224_v57, %v225_v61  ;;  %v211_v11 = vrot.slane %v561_v63, 7  ;;  %v227_v16 = vrot.slane %v561_v63, 1 }
 0x161   : > { %v565_v17 = vpop.eup %564  ;;  %v238_v18 = vsel %vm232_vm1, %v225_v61, %v226_v0  ;;  %v250_v19 = vadd.f32 %v557_v55, %v222_v9  ;;  %v228_v20 = vrot.slane %v563_v8, 1  ;;  %v212_v21 = vrot.slane %v563_v8, 7 }
 0x162   : > { %v567_v22 = vpop.eup %566  ;;  %v258_v23 = vsel %vm172_vm2, 1.0, %v238_v18  ;;  %v220_v24 = vsel %vm169_vm0, %v210_v1, %v211_v11  ;;  %v213_v25 = vrot.slane %v565_v17, 7  ;;  %v229_v26 = vrot.slane %v565_v17, 1 }
 0x163   : > { %v569_v27 = vpop.eup %568  ;;  %v897_v28 = vadd.f32 %v258_v23, %v250_v19  ;;  %v236_v34 = vsel %vm232_vm1, %v227_v16, %v228_v20  ;;  %v252_v35 = vadd.f32 %v561_v63, %v220_v24  ;;  %v230_v36 = vrot.slane %v567_v22, 1 }
 0x164   : > { %v215_v37 = vrot.slane %v569_v27, 7  ;;  %v260_v38 = vsel %vm172_vm2, 1.0, %v236_v34  ;;  %v218_v39 = vsel %vm169_vm0, %v212_v21, %v213_v25  ;;  %v221_v40 = vsel %vm169_vm0, %v209_v60, %v210_v1 }
 0x165   : > { %275 = vrot.lane.b32.xlu1 %v897_v28, %s693_s27  ;;  %v909_v41 = vadd.f32 %v260_v38, %v252_v35  ;;  %v234_v42 = vsel %vm232_vm1, %v229_v26, %v230_v36  ;;  %v254_v43 = vadd.f32 %v565_v17, %v218_v39  ;;  %v237_v44 = vsel %vm232_vm1, %v226_v0, %v227_v16 }
 0x166   : > { %v223_v45 = vsel %vm169_vm0, %v215_v37, %v208_v56  ;;  %v262_v46 = vsel %vm172_vm2, 1.0, %v234_v42  ;;  %v243_v47 = vsel %vm169_vm0, 1.0, %v221_v40  ;;  %v214_v48 = vrot.slane %v567_v22, 7 }
 0x167   : > { %v241_v50 = vsel %vm169_vm0, 1.0, %v223_v45  ;;  %v923_v51 = vadd.f32 %v262_v46, %v254_v43  ;;  %v251_v55 = vadd.f32 %v559_v59, %v243_v47  ;;  %v231_v60 = vrot.slane %v569_v27, 1 }
 0x168   : > { %v249_v61 = vadd.f32 %v555_v54, %v241_v50  ;;  %v216_v0 = vsel %vm169_vm0, %v214_v48, %v215_v37  ;;  %v219_v56 = vsel %vm169_vm0, %v211_v11, %v212_v21  ;;  %v235_v1 = vsel %vm232_vm1, %v228_v20, %v229_v26 }
 0x169   : > { %279 = vrot.lane.b32.xlu1 %v909_v41, %s693_s27  ;;  %v933_v9 = vadd.f32 %v251_v55, %v237_v44  ;;  %v240_v16 = vsel %vm232_vm1, %v231_v60, %v224_v57  ;;  %v256_v59 = vadd.f32 %v569_v27, %v216_v0  ;;  %v245_v54 = vsel %vm169_vm0, 1.0, %v219_v56 }
 0x16a   : > { %v265_v18 = vadd.f32 %v249_v61, %v239_v10  ;;  %v264_v19 = vsel %vm172_vm2, 1.0, %v240_v16  ;;  %v253_v11 = vadd.f32 %v563_v8, %v245_v54  ;;  %v217_v20 = vsel %vm169_vm0, %v213_v25, %v214_v48 }
 0x16b   : > { %v943_v21 = vadd.f32 %v264_v19, %v256_v59  ;;  %v233_v23 = vsel %vm232_vm1, %v230_v36, %v231_v60  ;;  %v247_v57 = vsel %vm169_vm0, 1.0, %v217_v20  ;;  %v954_v53 = vmul.f32 %v561_v63, %v178_v29 }
 0x16c   : > { %273 = vrot.lane.b32.xlu0 %v265_v18, %s693_s27  ;;  %v950_v24 = vadd.f32 %v253_v11, %v235_v1  ;;  %v255_v10 = vadd.f32 %v567_v22, %v247_v57  ;;  %v958_v25 = vmul.f32 %v563_v8, %v179_v30  ;;  %v964_v52 = vmul.f32 %v565_v17, %v180_v31 }
 0x16d   : > { %283 = vrot.lane.b32.xlu1 %v923_v51, %s693_s27  ;;  %v968_v26 = vmul.f32 %v567_v22, %v181_v32  ;;  %v972_v3 = vmul.f32 %v569_v27, %v182_v33 }
 0x16e   : > { %v974_v29 = vadd.f32 %v255_v10, %v233_v23 }
 0x170   : > { %289 = vrot.lane.b32.xlu0 %v265_v18, %s694_s28 }
 0x171   : > { %287 = vrot.lane.b32.xlu1 %v943_v21, %s693_s27 }
 0x174   : > { %293 = vrot.lane.b32.xlu0 %v933_v9, %s694_s28 }
 0x175   : > { %291 = vrot.lane.b32.xlu1 %v897_v28, %s694_s28 }
 0x178   : > { %297 = vrot.lane.b32.xlu0 %v950_v24, %s694_s28 }
 0x179   : > { %295 = vrot.lane.b32.xlu1 %v909_v41, %s694_s28 }
 0x17c   : > { %301 = vrot.lane.b32.xlu0 %v974_v29, %s694_s28 }
 0x17d   : > { %299 = vrot.lane.b32.xlu1 %v923_v51, %s694_s28 }
 0x181   : > { %277 = vrot.lane.b32.xlu1 %v933_v9, %s693_s27 }
 0x185   : > { %281 = vrot.lane.b32.xlu1 %v950_v24, %s693_s27 }
 0x189   : > { %285 = vrot.lane.b32.xlu1 %v974_v29, %s693_s27 }
 0x18d   : > { %303 = vrot.lane.b32.xlu1 %v943_v21, %s694_s28 }
 0x1d7   : > { %v276_v4 = vpop.permute.xlu1 %275 }
 0x1d8   : > { %v306_v49 = vsel %vm173_vm3, 3.0, %v276_v4 }
 0x1d9   : > { %v314_v22 = vadd.f32 %v306_v49, %v897_v28 }
 0x1db   : > { %v280_v6 = vpop.permute.xlu1 %279 }
 0x1dc   : > { %v308_v34 = vsel %vm173_vm3, 3.0, %v280_v6 }
 0x1dd   : > { %v316_v37 = vadd.f32 %v308_v34, %v909_v41 }
 0x1de   : > { %v274_v7 = vpop.permute.xlu0 %273 }
 0x1df   : > { %v305_v30 = vsel %vm173_vm3, 3.0, %v274_v7  ;;  %v284_v31 = vpop.permute.xlu1 %283 }
 0x1e0   : > { %v313_v32 = vadd.f32 %v305_v30, %v265_v18  ;;  %v310_v39 = vsel %vm173_vm3, 3.0, %v284_v31 }
 0x1e1   : > { %v318_v28 = vadd.f32 %v310_v39, %v923_v51 }
 0x1e2   : > { %v290_v33 = vpop.permute.xlu0 %289 }
 0x1e3   : > { %v321_v63 = vsel %vm174_vm4, 3.0, %v290_v33  ;;  %v288_v8 = vpop.permute.xlu1 %287 }
 0x1e4   : > { %v329_v17 = vadd.f32 %v321_v63, %v313_v32 }
 0x1e6   : > { %570 = vrcp.f32 %v329_v17  ;;  %v294_v43 = vpop.permute.xlu0 %293 }
 0x1e7   : > { %v292_v27 = vpop.permute.xlu1 %291  ;;  %v323_v51 = vsel %vm174_vm4, 3.0, %v294_v43 }
 0x1e8   : > { %v322_v35 = vsel %vm174_vm4, 3.0, %v292_v27 }
 0x1e9   : > { %v330_v36 = vadd.f32 %v322_v35, %v314_v22 }
 0x1ea   : > { %v298_v60 = vpop.permute.xlu0 %297 }
 0x1eb   : > { %572 = vrcp.f32 %v330_v36  ;;  %v296_v38 = vpop.permute.xlu1 %295  ;;  %v325_v54 = vsel %vm174_vm4, 3.0, %v298_v60 }
 0x1ec   : > { %v324_v40 = vsel %vm174_vm4, 3.0, %v296_v38 }
 0x1ed   : > { %v332_v42 = vadd.f32 %v324_v40, %v316_v37 }
 0x1ef   : > { %574 = vrcp.f32 %v332_v42  ;;  %v300_v44 = vpop.permute.xlu1 %299 }
 0x1f0   : > { %v571_v45 = vpop.eup %570  ;;  %v326_v46 = vsel %vm174_vm4, 3.0, %v300_v44 }
 0x1f1   : > { %v334_v47 = vadd.f32 %v326_v46, %v318_v28  ;;  %v353_v41 = vmul.f32 %v571_v45, %v880_v58 }
 0x1f3   : > { %576 = vrcp.f32 %v334_v47  ;;  %v278_v48 = vpop.permute.xlu1 %277 }
 0x1f4   : > { %v307_v50 = vsel %vm173_vm3, 3.0, %v278_v48 }
 0x1f5   : > { %v573_v55 = vpop.eup %572  ;;  %v315_v61 = vadd.f32 %v307_v50, %v933_v9  ;;  %v302_v9 = vpop.permute.xlu0 %301 }
 0x1f6   : > { %v354_v0 = vmul.f32 %v573_v55, %v882_v62  ;;  %v312_v62 = vsel %vm173_vm3, 3.0, %v288_v8 }
 0x1f7   : > { %v331_v56 = vadd.f32 %v323_v51, %v315_v61  ;;  %v282_v1 = vpop.permute.xlu1 %281 }
 0x1f8   : > { %v309_v16 = vsel %vm173_vm3, 3.0, %v282_v1 }
 0x1f9   : > { %v575_v58 = vpop.eup %574  ;;  %578 = vrcp.f32 %v331_v56  ;;  %v317_v59 = vadd.f32 %v309_v16, %v950_v24  ;;  %v327_v24 = vsel %vm174_vm4, 3.0, %v302_v9 }
 0x1fa   : > { %v356_v18 = vmul.f32 %v575_v58, %v954_v53  ;;  %v320_v53 = vadd.f32 %v312_v62, %v943_v21 }
 0x1fb   : > { %v333_v19 = vadd.f32 %v325_v54, %v317_v59  ;;  %v286_v11 = vpop.permute.xlu1 %285 }
 0x1fc   : > { %v311_v20 = vsel %vm173_vm3, 3.0, %v286_v11 }
 0x1fd   : > { %v577_v23 = vpop.eup %576  ;;  %580 = vrcp.f32 %v333_v19  ;;  %v319_v57 = vadd.f32 %v311_v20, %v974_v29 }
 0x1fe   : > { %v358_v10 = vmul.f32 %v577_v23, %v964_v52 }
 0x1ff   : > { %v335_v4 = vadd.f32 %v327_v24, %v319_v57  ;;  %v304_v6 = vpop.permute.xlu1 %303 }
 0x200   : > { %v328_v7 = vsel %vm174_vm4, 3.0, %v304_v6  ;;  %v364_v30 = vmax.f32 %v354_v0, %v358_v10 }
 0x201   : > { %582 = vrcp.f32 %v335_v4  ;;  %v336_v31 = vadd.f32 %v328_v7, %v320_v53 }
 0x203   : > { %v579_v32 = vpop.eup %578  ;;  %584 = vrcp.f32 %v336_v31 }
 0x204   : > { %v355_v33 = vmul.f32 %v579_v32, %v885_v2  ;;  %586 = vrcp.f32 %v149_v14 }
 0x205   : > { %588 = vrcp.f32 %v150_v15 }
 0x207   : > { %v581_v29 = vpop.eup %580 }
 0x208   : > { %v357_v21 = vmul.f32 %v581_v29, %v958_v25 }
 0x20a   : > { %v361_v52 = vmax.f32 %v353_v41, %v357_v21 }
 0x20b   : > { %v583_v63 = vpop.eup %582 }
 0x20c   : > { %v359_v5 = vmul.f32 %v583_v63, %v968_v26 }
 0x20d   : > { %v585_v8 = vpop.eup %584 }
 0x20e   : > { %v360_v49 = vmul.f32 %v585_v8, %v972_v3  ;;  %v362_v17 = vmax.f32 %v355_v33, %v359_v5  ;;  %v587_v22 = vpop.eup %586 }
 0x20f   : > { %v589_v34 = vpop.eup %588 }
 0x210   : > { %v363_v27 = vmax.f32 %v361_v52, %v362_v17  ;;  %v365_v2 = vmax.f32 %v356_v18, %v360_v49 }
 0x212   : > { %v366_v12 = vmax.f32 %v364_v30, %v365_v2  ;;  %v368_v14 = vmul.f32 %v587_v22, %v363_v27 }
 0x214   : > { %v370_v35 = vmul.f32 %v589_v34, %v366_v12 }
 0x216   : > { %v371_v13 = vadd.f32 %v370_v35, %v368_v14 }
 0x218   : > { %372 = vadd.xlane.f32.xlu0 %v371_v13 }
 0x2a5   : > { %v373_v15 = vpop.xlane.xlu0 %372 }
 0x2a6   : > { %v374_v25 = vrot.slane %v373_v15, 4 }
 0x2a8   : > { %v375_v36 = vadd.f32 %v374_v25, %v373_v15 }
 0x2aa   : > { %v376_v37 = vrot.slane %v375_v36, 2 }
 0x2ac   : > { %v377_v26 = vadd.f32 %v376_v37, %v375_v36 }
 0x2ae   : > { %v378_v38 = vrot.slane %v377_v26, 1 }
 0x2b0   : > { %v379_v39 = vadd.f32 %v378_v38, %v377_v26 }
 0x2b2   : > { %496 = vpush %v379_v39 }
 0x2e3   : > { %s497_s29 = spop %496 }
 0x2e4   : > { %v381_v3 = vstv %s497_s29 }
 0x2e5   : > { %590 = vrcp.f32 %v381_v3 }
 0x2ef   : > { %v591_v40 = vpop.eup %590 }
 0x2f0   : > { %498 = vpush %v591_v40 }
 0x321   : > { %s499_s11 = spop %498 }
 0x322   : > { %v384_v42 = vstv %s499_s11 }
 0x323   : > { %v385_v28 = vmul.f32 %v384_v42, %v368_v14  ;;  %v386_v43 = vmul.f32 %v384_v42, %v370_v35 }
 0x325   : > { %387 = vst [vmem:[%s134_s3] sm:$0xff] %v385_v28  ;;  %388 = vst [vmem:[%s134_s3 + $0x8] sm:$0xff] %v386_v43 }
 0x326   : > { %635 = shalt.err (!%p632_p2)
}
 0x327   : > { %s636_s26 = scalar_lea.hbm %s1054_s16, 256  ;;  %s640_s25 = scalar_lea.hbm %s1099_s1, 512 }
 0x328   : > { %p637_p4 = scmp.ne.s32.totalorder %s1054_s16, %s636_s26  ;;  %p641_p9 = scmp.lt.u32.totalorder %s1054_s16, %s1099_s1 }
 0x329   : > { %p642_p1 = scmp.lt.u32.totalorder %s640_s25, %s636_s26  ;;  %p644_p6 = scmp.lt.u32.totalorder %s636_s26, %s1054_s16 }
 0x32a   : > { %p638_p5 = pnand %p637_p4, %p1106_p11 }
 0x32b   : > { %p643_p3 = por %p642_p1, %p641_p9 }
 0x32c   : > { %p639_p7 = pneg %p638_p5 }
 0x32d   : > { %p645_p12 = por %p644_p6, %p643_p3 }
 0x32f   : > { %p646_p13 = pnand %p645_p12, %p639_p7 }
 0x331   : > { %649 = shalt.err (!%p646_p13)
}
 0x332   : > { %s696_s29 = smov 128   ;;  %s697_s2 = smov 8  }
 0x333   : > { %502 = dma.vmem_to_hbm [thread:$0]  (%p1106_p11), %s1049_s4, 256, %s1054_s16, %s390_s20, %s696_s29, %s696_s29, %s697_s2  }
 0x334 PF: > { %s418_s3 = sand.u32 1, %s676_s6   ;;  %p1107_p8 = scmp.ne.s32.totalorder %s1104_s19, 0 }
 0x335   : > { %p1108_p10 = scmp.ge.s32.totalorder %s688_s9, 2  ;;  %s419_s5 = scalar_lea.sflag [#allocation4], %s418_s3 }
 0x337   : > { %p509_p0 = pnand %p1108_p10, %p1107_p8 }
 0x339   : > { %671 = dma.done.wait (!%p509_p0), %s419_s5, 256  }
 0x33a   : > { %673 = vsyncadd (!%p509_p0), %s419_s5, 4294967040  ;;  %p14_p2 = scmp.ge.s32.totalorder %s733_s12, 4   ;;  %s1109_s6 = smov %s680_s7 }
 0x33b   : > { %s1110_s7 = smov %s684_s8  ;;  %s1111_s8 = smov %s745_s15 }
 0x33c   : > { %s1112_s9 = smov %s733_s12  ;;  %16 = sbr.rel (!%p14_p2) target bundleno = 5 (0x5), region = 69 }
 0x343   :  { %424 = vsyncpa [#allocation3], 1 }
 0x344   :  { %426 = vsyncpa [#allocation3 + $0x1], 1 }
 0x345   :  { %427 = vsyncpa [#allocation4], 1 }
 0x346   :  { %429 = vsyncpa [#allocation4 + $0x1], 1 }

</bundles_post_ra>
